<compile_context>
chip_gen: v7x
topology: tpu7x:2x2x1
jax: 0.10.0
libtpu: 0.0.40
codegen_flags: <defaults>
</compile_context>

<pallas_src>
import jax
import jax.numpy as jnp
from jax.experimental import pallas as pl
from jax.experimental.pallas import tpu as pltpu


def _round_up(x: int, m: int) -> int:
    return ((x + m - 1) // m) * m


def _matmul_kernel_f32_out(a_ref, b_ref, o_ref):
    """f32 output: accumulate directly into the resident output block."""
    @pl.when(pl.program_id(o_ref.ndim + 0 if False else -1) == 0)  # placeholder, replaced below
    def _():
        pass


# NOTE: the kernel bodies below are the ones actually used; the k axis is
# always the LAST grid axis, so `pl.program_id(...)` is taken via
# `pl.num_programs`-relative indexing done with a closure-free helper.
def _k_axis():
    # k is always the last grid axis; grids are 3-D (2-D matmul) or 4-D (batched).
    return -1


def _matmul_kernel_f32_out(a_ref, b_ref, o_ref):  # noqa: F811
    """f32 output: accumulate directly into the resident output block."""
    k_ax = 2 if a_ref.ndim == 2 else 3  # (i, j, k) or (b, i, j, k)
    # When blocks are squeezed (batched path) the refs are still 2-D, so
    # detect the grid rank from pl.num_programs at trace time instead.
    # Simpler: the k axis is the last grid axis in both layouts.
    del k_ax

    @pl.when(pl.program_id(_grid_rank() - 1) == 0)
    def _():
        o_ref[...] = jnp.zeros_like(o_ref)

    o_ref[...] += jnp.dot(
        a_ref[...], b_ref[...], preferred_element_type=jnp.float32
    )


def _matmul_kernel_acc(a_ref, b_ref, o_ref, acc_ref):
    """Narrow output dtype: keep a f32 VMEM accumulator, cast at the end."""
    k = pl.program_id(_grid_rank() - 1)

    @pl.when(k == 0)
    def _():
        acc_ref[...] = jnp.zeros_like(acc_ref)

    acc_ref[...] += jnp.dot(
        a_ref[...], b_ref[...], preferred_element_type=jnp.float32
    )

    @pl.when(k == pl.num_programs(_grid_rank() - 1) - 1)
    def _():
        o_ref[...] = acc_ref[...].astype(o_ref.dtype)


# The current grid rank (3 for plain 2-D matmul, 4 for batched).  Set by the
# wrapper immediately before tracing the pallas_call; read at trace time only.
_GRID_RANK = 3


def _grid_rank() -> int:
    return _GRID_RANK


def _pallas_matmul(a, b, out_dtype, tm, tn, tk):
    """Core tiled matmul. `a`/`b` are 2-D (M,K)/(K,N) or 3-D (B,M,K)/(B,K,N)."""
    global _GRID_RANK

    batched = a.ndim == 3
    if batched:
        B, M, K = a.shape
        _, _, N = b.shape
    else:
        M, K = a.shape
        _, N = b.shape

    itemsize = jnp.dtype(out_dtype).itemsize
    sublane = {4: 8, 2: 16, 1: 32}.get(itemsize, 8)

    # Larger tk when K is big: fewer grid steps, better amortization.
    if K >= 4096:
        tk = max(tk, 1024)

    # Tile sizes: respect (8, 128) block rules (sublane rounded for packing),
    # shrink for small dims.
    tm = min(tm, _round_up(M, sublane))
    tn = min(tn, _round_up(N, 128))
    tk = min(tk, _round_up(K, 128))

    # Zero-pad to tile multiples (padding contributes zeros to the products).
    Mp, Kp, Np = _round_up(M, tm), _round_up(K, tk), _round_up(N, tn)
    pad_a = [(0, Mp - M), (0, Kp - K)]
    pad_b = [(0, Kp - K), (0, Np - N)]
    if batched:
        pad_a = [(0, 0)] + pad_a
        pad_b = [(0, 0)] + pad_b
    if (Mp, Kp) != (M, K):
        a = jnp.pad(a, pad_a)
    if (Kp, Np) != (K, N):
        b = jnp.pad(b, pad_b)

    f32_out = out_dtype == jnp.float32
    kernel = _matmul_kernel_f32_out if f32_out else _matmul_kernel_acc
    scratch_shapes = [] if f32_out else [pltpu.VMEM((tm, tn), jnp.float32)]

    nb = B if batched else 1
    cost = pl.CostEstimate(
        flops=2 * nb * Mp * Np * Kp,
        transcendentals=0,
        bytes_accessed=nb * (Mp * Kp + Kp * Np + Mp * Np) * itemsize,
    )

    if batched:
        grid = (B, Mp // tm, Np // tn, Kp // tk)
        in_specs = [
            pl.BlockSpec((None, tm, tk), lambda bi, i, j, k: (bi, i, k)),
            pl.BlockSpec((None, tk, tn), lambda bi, i, j, k: (bi, k, j)),
        ]
        out_specs = pl.BlockSpec((None, tm, tn), lambda bi, i, j, k: (bi, i, j))
        out_shape = jax.ShapeDtypeStruct((B, Mp, Np), out_dtype)
        dims = ("parallel", "parallel", "parallel", "arbitrary")
        _GRID_RANK = 4
    else:
        grid = (Mp // tm, Np // tn, Kp // tk)
        in_specs = [
            pl.BlockSpec((tm, tk), lambda i, j, k: (i, k)),
            pl.BlockSpec((tk, tn), lambda i, j, k: (k, j)),
        ]
        out_specs = pl.BlockSpec((tm, tn), lambda i, j, k: (i, j))
        out_shape = jax.ShapeDtypeStruct((Mp, Np), out_dtype)
        dims = ("parallel", "parallel", "arbitrary")
        _GRID_RANK = 3

    out = pl.pallas_call(
        kernel,
        out_shape=out_shape,
        grid_spec=pltpu.PrefetchScalarGridSpec(
            num_scalar_prefetch=0,
            grid=grid,
            in_specs=in_specs,
            out_specs=out_specs,
            scratch_shapes=scratch_shapes,
        ),
        compiler_params=pltpu.CompilerParams(
            dimension_semantics=dims,
            vmem_limit_bytes=48 * 1024 * 1024,
        ),
        cost_estimate=cost,
    )(a, b)

    if (Mp, Np) != (M, N):
        out = out[..., :M, :N]
    return out


def matmul(a: jax.Array, b: jax.Array, *, tm: int = 512, tn: int = 512,
           tk: int = 512) -> jax.Array:
    """Pallas TPU equivalent of torch `a @ b` (2-D, batched, vector cases)."""
    # Match torch result-dtype semantics (inputs normally share a dtype).
    out_dtype = jnp.result_type(a.dtype, b.dtype)
    if a.dtype != out_dtype:
        a = a.astype(out_dtype)
    if b.dtype != out_dtype:
        b = b.astype(out_dtype)

    # torch `@` vector promotion rules.
    a_vec = a.ndim == 1
    b_vec = b.ndim == 1
    if a_vec:
        a = a[None, :]
    if b_vec:
        b = b[:, None]

    if a.ndim == 2 and b.ndim == 2:
        out = _pallas_matmul(a, b, out_dtype, tm, tn, tk)
    else:
        # Batched matmul with batch-dim broadcasting, flattened to one
        # "parallel" batch grid axis.
        M, K = a.shape[-2:]
        K2, N = b.shape[-2:]
        assert K == K2, "inner dimensions must match"
        batch_shape = jnp.broadcast_shapes(a.shape[:-2], b.shape[:-2])
        a = jnp.broadcast_to(a, batch_shape + (M, K)).reshape((-1, M, K))
        b = jnp.broadcast_to(b, batch_shape + (K, N)).reshape((-1, K, N))
        out = _pallas_matmul(a, b, out_dtype, tm, tn, tk)
        out = out.reshape(batch_shape + (M, N))

    if a_vec and b_vec:
        out = out[..., 0, 0]
    elif a_vec:
        out = out[..., 0, :]
    elif b_vec:
        out = out[..., 0]
    return out


if __name__ == "__main__":
    key = jax.random.PRNGKey(0)
    ka, kb, kc, kd, ke, kf = jax.random.split(key, 6)

    # 1) Small aligned f32 2-D case (direct-accumulate-into-output path).
    M, K, N = 128, 256, 128
    a = jax.random.normal(ka, (M, K), dtype=jnp.float32)
    b = jax.random.normal(kb, (K, N), dtype=jnp.float32)
    out = jax.block_until_ready(matmul(a, b))
    ref = jnp.dot(a, b)
    assert out.shape == (M, N) and out.dtype == ref.dtype
    assert jnp.allclose(out, ref, atol=1e-4, rtol=1e-4)

    # 2) Unaligned 2-D shapes exercising the padding path.
    M2, K2, N2 = 50, 70, 33
    a2 = jax.random.normal(kc, (M2, K2), dtype=jnp.float32)
    b2 = jax.random.normal(kd, (K2, N2), dtype=jnp.float32)
    out2 = jax.block_until_ready(matmul(a2, b2))
    ref2 = jnp.dot(a2, b2)
    assert out2.shape == (M2, N2)
    assert jnp.allclose(out2, ref2, atol=1e-4, rtol=1e-4)

    # 3) bf16 inputs (f32 accumulator scratch path, bf16 output).
    a3 = a.astype(jnp.bfloat16)
    b3 = b.astype(jnp.bfloat16)
    out3 = jax.block_until_ready(matmul(a3, b3))
    ref3 = jnp.dot(a3.astype(jnp.float32), b3.astype(jnp.float32))
    assert out3.dtype == jnp.bfloat16
    assert jnp.allclose(out3.astype(jnp.float32), ref3, atol=2e-1, rtol=2e-2)

    # 4) Batched 4-D matmul (flexnet attention-style a @ b), small shapes.
    a4 = jax.random.normal(ke, (2, 4, 16, 32), dtype=jnp.float32)
    b4 = jax.random.normal(kf, (2, 4, 32, 16), dtype=jnp.float32)
    out4 = jax.block_until_ready(matmul(a4, b4))
    ref4 = jnp.matmul(a4, b4)
    assert out4.shape == (2, 4, 16, 16)
    assert jnp.allclose(out4, ref4, atol=1e-4, rtol=1e-4)

    # 5) Broadcast batch dims: 2-D rhs against 4-D lhs.
    b5 = jax.random.normal(kb, (32, 16), dtype=jnp.float32)
    out5 = jax.block_until_ready(matmul(a4, b5))
    ref5 = jnp.matmul(a4, b5)
    assert out5.shape == (2, 4, 16, 16)
    assert jnp.allclose(out5, ref5, atol=1e-4, rtol=1e-4)

    print("KERNEL_OK")
</pallas_src>

<mosaic_0001>
module attributes {stable_mosaic.version = 11 : i64} {
  func.func @_matmul_kernel_f32_out(%arg0: i32, %arg1: i32, %arg2: i32, %arg3: memref<128x256xf32, #tpu.memory_space<vmem>>, %arg4: memref<256x128xf32, #tpu.memory_space<vmem>>, %arg5: memref<128x128xf32, #tpu.memory_space<vmem>>) attributes {dimension_semantics = [#tpu.dimension_semantics<parallel>, #tpu.dimension_semantics<parallel>, #tpu.dimension_semantics<arbitrary>], iteration_bounds = array<i64: 1, 1, 1>, scalar_prefetch = 0 : i64, scratch_operands = 0 : i64, tpu.core_type = #tpu.core_type<tc>, window_params = [{transform_indices = @transform_0, window_bounds = array<i64: 128, 256>}, {transform_indices = @transform_1, window_bounds = array<i64: 256, 128>}, {transform_indices = @transform_2, window_bounds = array<i64: 128, 128>}]} {
    %c0_i32 = arith.constant 0 : i32
    %0 = arith.cmpi eq, %arg2, %c0_i32 : i32
    %1 = arith.extui %0 : i1 to i32
    %c0_i32_0 = arith.constant 0 : i32
    %2 = arith.cmpi ne, %1, %c0_i32_0 : i32
    scf.if %2 {
      %cst_8 = arith.constant 0.000000e+00 : f32
      %9 = vector.broadcast %cst_8 : f32 to vector<128x128xf32>
      %c0_9 = arith.constant 0 : index
      %c0_10 = arith.constant 0 : index
      %10 = vector.load %arg5[%c0_9, %c0_10] : memref<128x128xf32, #tpu.memory_space<vmem>>, vector<128x128xf32>
      tpu.vector_store %arg5[%c0_9, %c0_10], %9 {strides = array<i32>} : memref<128x128xf32, #tpu.memory_space<vmem>>, vector<128x128xf32>,
    } else {
    }
    %c0 = arith.constant 0 : index
    %c0_1 = arith.constant 0 : index
    %3 = vector.load %arg5[%c0, %c0_1] : memref<128x128xf32, #tpu.memory_space<vmem>>, vector<128x128xf32>
    %c0_2 = arith.constant 0 : index
    %c0_3 = arith.constant 0 : index
    %4 = vector.load %arg3[%c0_2, %c0_3] : memref<128x256xf32, #tpu.memory_space<vmem>>, vector<128x256xf32>
    %c0_4 = arith.constant 0 : index
    %c0_5 = arith.constant 0 : index
    %5 = vector.load %arg4[%c0_4, %c0_5] : memref<256x128xf32, #tpu.memory_space<vmem>>, vector<256x128xf32>
    %cst = arith.constant dense<0.000000e+00> : vector<128x128xf32>
    %6 = tpu.matmul %4, %5, %cst {dimension_numbers = #tpu.dot_dimension_numbers<[1], [0], [0], [1], [0, 0, 1, 1], [], []>} : vector<128x256xf32>, vector<256x128xf32>, vector<128x128xf32> -> vector<128x128xf32>
    %7 = arith.addf %3, %6 : vector<128x128xf32>
    %c0_6 = arith.constant 0 : index
    %c0_7 = arith.constant 0 : index
    %8 = vector.load %arg5[%c0_6, %c0_7] : memref<128x128xf32, #tpu.memory_space<vmem>>, vector<128x128xf32>
    tpu.vector_store %arg5[%c0_6, %c0_7], %7 {strides = array<i32>} : memref<128x128xf32, #tpu.memory_space<vmem>>, vector<128x128xf32>,
    return
  }
  func.func @transform_0(%arg0: i32, %arg1: i32, %arg2: i32) -> (i32, i32) {
    %c0_i32 = arith.constant 0 : i32
    return %arg0, %arg2 : i32, i32
  }
  func.func @transform_1(%arg0: i32, %arg1: i32, %arg2: i32) -> (i32, i32) {
    %c0_i32 = arith.constant 0 : i32
    return %arg2, %arg1 : i32, i32
  }
  func.func @transform_2(%arg0: i32, %arg1: i32, %arg2: i32) -> (i32, i32) {
    %c0_i32 = arith.constant 0 : i32
    return %arg0, %arg1 : i32, i32
  }
}

</mosaic_0001>

<bundles_post_ra>
// kernel: tpu_custom_call.1
= control target key start
LH: loop header
LB: loop body
LE: loop exit
PB: predicated region body
PF: predicated region fallthrough
CT: control target
= control target key end

     0   :  { %7 = vsyncpa [#allocation3], 0  ;;  %s607_s0 = inlined_call_operand.hbm [shape: f32[128,256], index: 0, kind: input, shape index: {}]   ;;  %s608_s1 = inlined_call_operand.hbm [shape: f32[256,128], index: 1, kind: input, shape index: {}]   ;;  %s609_s2 = inlined_call_operand.hbm [shape: f32[128,128], index: 2, kind: output, shape index: {}]  }
   0x1   :  { %8 = vsyncpa [#allocation6], 0 }
   0x2   :  { %9 = vsyncpa [#allocation4], 0  ;;  %s543_s9 = smov [#allocation2]   ;;  %s471_s13 = scalar_lea.hbm %s607_s0, 4096 }
   0x3   :  { %s15_s10 = sshll.u32 %s543_s9, 4  ;;  %p472_p0 = scmp.ne.s32.totalorder %s607_s0, %s471_s13  ;;  %s16_s10 = int_to_ptr.vmem [resolvable:$true] %s15_s10 }
   0x4   :  { %p475_p1 = scmp.lt.u32.totalorder %s471_s13, %s607_s0 }
   0x6   :  { %p477_p2 = pnand %p475_p1, %p472_p0 }
   0x8   :  { %480 = shalt.err (!%p477_p2)
}
   0x9   :  { %s481_s18 = scalar_lea.vmem %s16_s10, 4096  ;;  %p486_p4 = scmp.lt.s32.totalorder %s16_s10, %s16_s10 }
   0xa   :  { %p482_p3 = scmp.ne.s32.totalorder %s16_s10, %s481_s18  ;;  %p487_p5 = scmp.lt.s32.totalorder %s481_s18, %s481_s18 }
   0xc   :  { %p488_p6 = por %p487_p5, %p486_p4 }
   0xe   :  { %p489_p7 = pnand %p488_p6, %p482_p3 }
  0x10   :  { %492 = shalt.err (!%p489_p7)
}
  0x11   :  { %s544_s19 = smov 256   ;;  %s545_s20 = smov 16  }
  0x12   :  { %21 = dma.hbm_to_vmem [thread:$0]  %s607_s0, 4096, %s16_s10, [#allocation3], %s544_s19, %s544_s19, %s545_s20  }
  0x13   :  { %s546_s23 = smov [#allocation5]   ;;  %s493_s27 = scalar_lea.hbm %s608_s1, 4096 }
  0x14   :  { %s27_s24 = sshll.u32 %s546_s23, 4  ;;  %p494_p8 = scmp.ne.s32.totalorder %s608_s1, %s493_s27  ;;  %s28_s24 = int_to_ptr.vmem [resolvable:$true] %s27_s24 }
  0x15   :  { %p497_p9 = scmp.lt.u32.totalorder %s493_s27, %s608_s1 }
  0x17   :  { %p499_p10 = pnand %p497_p9, %p494_p8 }
  0x19   :  { %502 = shalt.err (!%p499_p10)
}
  0x1a   :  { %s503_s4 = scalar_lea.vmem %s28_s24, 4096  ;;  %p508_p12 = scmp.lt.s32.totalorder %s28_s24, %s28_s24 }
  0x1b   :  { %p504_p11 = scmp.ne.s32.totalorder %s28_s24, %s503_s4  ;;  %p509_p13 = scmp.lt.s32.totalorder %s503_s4, %s503_s4 }
  0x1d   :  { %p510_p0 = por %p509_p13, %p508_p12 }
  0x1f   :  { %p511_p1 = pnand %p510_p0, %p504_p11 }
  0x21   :  { %514 = shalt.err (!%p511_p1)
}
  0x22   :  { %s547_s0 = smov 128   ;;  %s548_s5 = smov 8  }
  0x23   :  { %33 = dma.hbm_to_vmem [thread:$0]  %s608_s1, 4096, %s28_s24, [#allocation6], %s547_s0, %s547_s0, %s548_s5  }
  0x24   :  { %537 = dma.done.wait [#allocation3], 4096  }
  0x25   :  { %538 = vsyncadd [#allocation3], 4294963200 }
  0x26   :  { %539 = dma.done.wait [#allocation6], 4096  }
  0x27   :  { %540 = vsyncadd [#allocation6], 4294963200  ;;  %v124_v0 = vld [vmem:[#allocation5 + $0x80] sm:$0xff]  ;;  %v125_v1 = vld [vmem:[#allocation5 + $0x88] sm:$0xff]  ;;  %s549_s1 = smov [#allocation7]  }
  0x28   :  { %v108_v2 = vld [vmem:[#allocation5] sm:$0xff]  ;;  %v415_v3 = vpack.c.bf16 %v125_v1, %v124_v0  ;;  %v109_v4 = vld [vmem:[#allocation5 + $0x8] sm:$0xff]  ;;  %v126_v5 = vld [vmem:[#allocation5 + $0x90] sm:$0xff]  ;;  %s322_s8 = sshll.u32 %s549_s1, 4  ;;  %s323_s8 = int_to_ptr.vmem [resolvable:$true] %s322_s8 }
  0x29   :  { %v127_v6 = vld [vmem:[#allocation5 + $0x98] sm:$0xff]  ;;  %v417_v7 = vpack.c.bf16 %v109_v4, %v108_v2  ;;  %v110_v9 = vld [vmem:[#allocation5 + $0x10] sm:$0xff]  ;;  %v128_v11 = vld [vmem:[#allocation5 + $0xa0] sm:$0xff]  ;;  %s515_s9 = scalar_lea.vmem %s323_s8, 2048  ;;  %p520_p3 = scmp.lt.s32.totalorder %s323_s8, %s323_s8 }
  0x2a   :  { %v419_v8 = vpack.c.bf16 %v127_v6, %v126_v5  ;;  %v111_v10 = vld [vmem:[#allocation5 + $0x18] sm:$0xff]  ;;  %416 = vmatprep.subr.bf16.mxu0 %v415_v3  ;;  %447 = vmatprep.subr.bf16.mxu1 %v415_v3  ;;  %v129_v12 = vld [vmem:[#allocation5 + $0xa8] sm:$0xff]  ;;  %v112_v15 = vld [vmem:[#allocation5 + $0x20] sm:$0xff]  ;;  %p516_p2 = scmp.ne.s32.totalorder %s323_s8, %s515_s9  ;;  %p521_p4 = scmp.lt.s32.totalorder %s515_s9, %s515_s9 }
  0x2b   :  { %418 = vmatpush3.bf16.msra.mxu0 %v417_v7  ;;  %455 = vmatpush3.bf16.msra.mxu1 %v417_v7  ;;  %v421_v13 = vpack.c.bf16 %v111_v10, %v110_v9  ;;  %v423_v14 = vpack.c.bf16 %v129_v12, %v128_v11  ;;  %v113_v16 = vld [vmem:[#allocation5 + $0x28] sm:$0xff]  ;;  %v130_v17 = vld [vmem:[#allocation5 + $0xb0] sm:$0xff]  ;;  %v131_v18 = vld [vmem:[#allocation5 + $0xb8] sm:$0xff] }
  0x2c   :  { %420 = vmatprep.subr.bf16.mxu0 %v419_v8  ;;  %448 = vmatprep.subr.bf16.mxu1 %v419_v8  ;;  %v425_v19 = vpack.c.bf16 %v113_v16, %v112_v15  ;;  %v427_v20 = vpack.c.bf16 %v131_v18, %v130_v17  ;;  %v114_v21 = vld [vmem:[#allocation5 + $0x30] sm:$0xff]  ;;  %v115_v22 = vld [vmem:[#allocation5 + $0x38] sm:$0xff]  ;;  %v132_v23 = vld [vmem:[#allocation5 + $0xc0] sm:$0xff]  ;;  %p522_p5 = por %p521_p4, %p520_p3 }
  0x2d   :  { %v133_v24 = vld [vmem:[#allocation5 + $0xc8] sm:$0xff]  ;;  %v429_v27 = vpack.c.bf16 %v115_v22, %v114_v21  ;;  %v116_v29 = vld [vmem:[#allocation5 + $0x40] sm:$0xff]  ;;  %v134_v31 = vld [vmem:[#allocation5 + $0xd0] sm:$0xff] }
  0x2e   :  { %v77_v25 = vld [vmem:[#allocation2 + $0x8] sm:$0xff]  ;;  %v431_v28 = vpack.c.bf16 %v133_v24, %v132_v23  ;;  %v135_v32 = vld [vmem:[#allocation5 + $0xd8] sm:$0xff]  ;;  %v118_v35 = vld [vmem:[#allocation5 + $0x50] sm:$0xff]  ;;  %p523_p6 = pnand %p522_p5, %p516_p2 }
  0x2f   :  { %422 = vmatpush3.bf16.msra.mxu0 %v421_v13  ;;  %456 = vmatpush3.bf16.msra.mxu1 %v421_v13  ;;  %v93_v26 = vld [vmem:[#allocation2 + $0x88] sm:$0xff]  ;;  %v435_v34 = vpack.c.bf16 %v135_v32, %v134_v31  ;;  %v119_v36 = vld [vmem:[#allocation5 + $0x58] sm:$0xff]  ;;  %v136_v37 = vld [vmem:[#allocation5 + $0xe0] sm:$0xff] }
  0x30   :  { %424 = vmatprep.subr.bf16.mxu0 %v423_v14  ;;  %449 = vmatprep.subr.bf16.mxu1 %v423_v14  ;;  %v117_v30 = vld [vmem:[#allocation5 + $0x48] sm:$0xff]  ;;  %v437_v39 = vpack.c.bf16 %v119_v36, %v118_v35  ;;  %v120_v41 = vld [vmem:[#allocation5 + $0x60] sm:$0xff]  ;;  %v138_v43 = vld [vmem:[#allocation5 + $0xf0] sm:$0xff] }
  0x31   :  { %204 = vmatprep.mubr.f32.mxu0 %v77_v25  ;;  %244 = vmatprep.mubr.f32.mxu1 %v93_v26  ;;  %v433_v33 = vpack.c.bf16 %v117_v30, %v116_v29  ;;  %v137_v38 = vld [vmem:[#allocation5 + $0xe8] sm:$0xff]  ;;  %v139_v44 = vld [vmem:[#allocation5 + $0xf8] sm:$0xff]  ;;  %v122_v47 = vld [vmem:[#allocation5 + $0x70] sm:$0xff] }
  0x32   :  { %v439_v40 = vpack.c.bf16 %v137_v38, %v136_v37  ;;  %v121_v42 = vld [vmem:[#allocation5 + $0x68] sm:$0xff]  ;;  %v443_v46 = vpack.c.bf16 %v139_v44, %v138_v43  ;;  %v123_v48 = vld [vmem:[#allocation5 + $0x78] sm:$0xff]  ;;  %v76_v50 = vld [vmem:[#allocation2] sm:$0xff] }
  0x33   :  { %426 = vmatpush3.bf16.msra.mxu0 %v425_v19  ;;  %457 = vmatpush3.bf16.msra.mxu1 %v425_v19  ;;  %v441_v45 = vpack.c.bf16 %v121_v42, %v120_v41  ;;  %v445_v49 = vpack.c.bf16 %v123_v48, %v122_v47  ;;  %v92_v51 = vld [vmem:[#allocation2 + $0x80] sm:$0xff]  ;;  %v79_v52 = vld [vmem:[#allocation2 + $0x18] sm:$0xff]  ;;  %v78_v54 = vld [vmem:[#allocation2 + $0x10] sm:$0xff] }
  0x34   :  { %428 = vmatprep.subr.bf16.mxu0 %v427_v20  ;;  %450 = vmatprep.subr.bf16.mxu1 %v427_v20  ;;  %v95_v53 = vld [vmem:[#allocation2 + $0x98] sm:$0xff]  ;;  %v94_v55 = vld [vmem:[#allocation2 + $0x90] sm:$0xff]  ;;  %v81_v56 = vld [vmem:[#allocation2 + $0x28] sm:$0xff] }
  0x35   :  { %v97_v57 = vld [vmem:[#allocation2 + $0xa8] sm:$0xff]  ;;  %v80_v58 = vld [vmem:[#allocation2 + $0x20] sm:$0xff]  ;;  %v83_v60 = vld [vmem:[#allocation2 + $0x38] sm:$0xff] }
  0x36   :  { %v96_v59 = vld [vmem:[#allocation2 + $0xa0] sm:$0xff]  ;;  %v99_v61 = vld [vmem:[#allocation2 + $0xb8] sm:$0xff]  ;;  %v82_v62 = vld [vmem:[#allocation2 + $0x30] sm:$0xff] }
  0x37   :  { %430 = vmatpush3.bf16.msra.mxu0 %v429_v27  ;;  %458 = vmatpush3.bf16.msra.mxu1 %v429_v27  ;;  %v98_v63 = vld [vmem:[#allocation2 + $0xb0] sm:$0xff]  ;;  %v85_v0 = vld [vmem:[#allocation2 + $0x48] sm:$0xff]  ;;  %v84_v2 = vld [vmem:[#allocation2 + $0x40] sm:$0xff] }
  0x38   :  { %432 = vmatprep.subr.bf16.mxu0 %v431_v28  ;;  %451 = vmatprep.subr.bf16.mxu1 %v431_v28  ;;  %v101_v1 = vld [vmem:[#allocation2 + $0xc8] sm:$0xff]  ;;  %v100_v3 = vld [vmem:[#allocation2 + $0xc0] sm:$0xff]  ;;  %v87_v4 = vld [vmem:[#allocation2 + $0x58] sm:$0xff] }
  0x39   :  { %v103_v5 = vld [vmem:[#allocation2 + $0xd8] sm:$0xff]  ;;  %v86_v6 = vld [vmem:[#allocation2 + $0x50] sm:$0xff]  ;;  %v89_v8 = vld [vmem:[#allocation2 + $0x68] sm:$0xff] }
  0x3a   :  { %v102_v7 = vld [vmem:[#allocation2 + $0xd0] sm:$0xff]  ;;  %v105_v9 = vld [vmem:[#allocation2 + $0xe8] sm:$0xff]  ;;  %v88_v10 = vld [vmem:[#allocation2 + $0x60] sm:$0xff] }
  0x3b   :  { %434 = vmatpush3.bf16.msra.mxu0 %v433_v33  ;;  %459 = vmatpush3.bf16.msra.mxu1 %v433_v33  ;;  %v104_v11 = vld [vmem:[#allocation2 + $0xe0] sm:$0xff]  ;;  %v91_v12 = vld [vmem:[#allocation2 + $0x78] sm:$0xff]  ;;  %v90_v14 = vld [vmem:[#allocation2 + $0x70] sm:$0xff] }
  0x3c   :  { %436 = vmatprep.subr.bf16.mxu0 %v435_v34  ;;  %452 = vmatprep.subr.bf16.mxu1 %v435_v34  ;;  %v107_v13 = vld [vmem:[#allocation2 + $0xf8] sm:$0xff]  ;;  %v106_v15 = vld [vmem:[#allocation2 + $0xf0] sm:$0xff] }
  0x3f   :  { %438 = vmatpush3.bf16.msra.mxu0 %v437_v39  ;;  %460 = vmatpush3.bf16.msra.mxu1 %v437_v39 }
  0x40   :  { %440 = vmatprep.subr.bf16.mxu0 %v439_v40  ;;  %453 = vmatprep.subr.bf16.mxu1 %v439_v40 }
  0x43   :  { %442 = vmatpush3.bf16.msra.mxu0 %v441_v45  ;;  %461 = vmatpush3.bf16.msra.mxu1 %v441_v45 }
  0x44   :  { %444 = vmatprep.subr.bf16.mxu0 %v443_v46  ;;  %454 = vmatprep.subr.bf16.mxu1 %v443_v46 }
  0x47   :  { %446 = vmatpush3.bf16.msra.mxu0 %v445_v49  ;;  %462 = vmatpush3.bf16.msra.mxu1 %v445_v49 }
  0x4a   :  { %205 = vmatmul.mubr.f32.vlgmr.msra.gmra.mrb[0].mxu0 %v76_v50  ;;  %245 = vmatmul.mubr.f32.vlgmr.msra.gmra.mrb[0].mxu1 %v92_v51 }
  0x4b   :  { %209 = vmatprep.mubr.f32.mxu0 %v79_v52  ;;  %249 = vmatprep.mubr.f32.mxu1 %v95_v53 }
  0x4e   :  { %210 = vmatmul.mubr.f32.gmra.mrb[2].mxu0 %v78_v54  ;;  %250 = vmatmul.mubr.f32.gmra.mrb[2].mxu1 %v94_v55 }
  0x4f   :  { %214 = vmatprep.mubr.f32.mxu0 %v81_v56  ;;  %254 = vmatprep.mubr.f32.mxu1 %v97_v57 }
  0x52   :  { %215 = vmatmul.mubr.f32.gmra.mrb[4].mxu0 %v80_v58  ;;  %255 = vmatmul.mubr.f32.gmra.mrb[4].mxu1 %v96_v59 }
  0x53   :  { %219 = vmatprep.mubr.f32.mxu0 %v83_v60  ;;  %259 = vmatprep.mubr.f32.mxu1 %v99_v61 }
  0x56   :  { %220 = vmatmul.mubr.f32.gmra.mrb[6].mxu0 %v82_v62  ;;  %260 = vmatmul.mubr.f32.gmra.mrb[6].mxu1 %v98_v63 }
  0x57   :  { %224 = vmatprep.mubr.f32.mxu0 %v85_v0  ;;  %264 = vmatprep.mubr.f32.mxu1 %v101_v1 }
  0x5a   :  { %225 = vmatmul.mubr.f32.gmra.mrb[8].mxu0 %v84_v2  ;;  %265 = vmatmul.mubr.f32.gmra.mrb[8].mxu1 %v100_v3 }
  0x5b   :  { %229 = vmatprep.mubr.f32.mxu0 %v87_v4  ;;  %269 = vmatprep.mubr.f32.mxu1 %v103_v5 }
  0x5e   :  { %230 = vmatmul.mubr.f32.gmra.mrb[10].mxu0 %v86_v6  ;;  %270 = vmatmul.mubr.f32.gmra.mrb[10].mxu1 %v102_v7 }
  0x5f   :  { %234 = vmatprep.mubr.f32.mxu0 %v89_v8  ;;  %274 = vmatprep.mubr.f32.mxu1 %v105_v9 }
  0x62   :  { %235 = vmatmul.mubr.f32.gmra.mrb[12].mxu0 %v88_v10  ;;  %275 = vmatmul.mubr.f32.gmra.mrb[12].mxu1 %v104_v11 }
  0x63   :  { %239 = vmatprep.mubr.f32.mxu0 %v91_v12  ;;  %279 = vmatprep.mubr.f32.mxu1 %v107_v13 }
  0x66   :  { %240 = vmatmul.mubr.f32.gmra.mrb[14].mxu0 %v90_v14  ;;  %280 = vmatmul.mubr.f32.gmra.mrb[14].mxu1 %v106_v15 }
 0x11d   :  { %v367_v16 = vpop.f32.mrb[0].mxu0  ;;  %v391_v17 = vpop.f32.mrb[0].mxu1 }
 0x11e   :  { %v368_v18 = vpop.f32.mrb[1].mxu0  ;;  %v392_v19 = vpop.f32.mrb[1].mxu1 }
 0x11f   :  { %v369_v20 = vadd.f32 %v368_v18, %v367_v16  ;;  %v393_v21 = vadd.f32 %v392_v19, %v391_v17 }
 0x121   :  { %v370_v22 = vpop.f32.mrb[2].mxu0  ;;  %v394_v23 = vpop.f32.mrb[2].mxu1  ;;  %301 = vst [vmem:[#allocation7] sm:$0xff] %v369_v20  ;;  %309 = vst [vmem:[#allocation7 + $0x40] sm:$0xff] %v393_v21 }
 0x122   :  { %v371_v24 = vpop.f32.mrb[3].mxu0  ;;  %v395_v25 = vpop.f32.mrb[3].mxu1 }
 0x123   :  { %v372_v26 = vadd.f32 %v371_v24, %v370_v22  ;;  %v396_v27 = vadd.f32 %v395_v25, %v394_v23 }
 0x125   :  { %v373_v28 = vpop.f32.mrb[4].mxu0  ;;  %v397_v29 = vpop.f32.mrb[4].mxu1  ;;  %302 = vst [vmem:[#allocation7 + $0x8] sm:$0xff] %v372_v26  ;;  %310 = vst [vmem:[#allocation7 + $0x48] sm:$0xff] %v396_v27 }
 0x126   :  { %v374_v30 = vpop.f32.mrb[5].mxu0  ;;  %v398_v31 = vpop.f32.mrb[5].mxu1 }
 0x127   :  { %v375_v32 = vadd.f32 %v374_v30, %v373_v28  ;;  %v399_v33 = vadd.f32 %v398_v31, %v397_v29 }
 0x129   :  { %v376_v34 = vpop.f32.mrb[6].mxu0  ;;  %v400_v35 = vpop.f32.mrb[6].mxu1  ;;  %303 = vst [vmem:[#allocation7 + $0x10] sm:$0xff] %v375_v32  ;;  %311 = vst [vmem:[#allocation7 + $0x50] sm:$0xff] %v399_v33 }
 0x12a   :  { %v377_v36 = vpop.f32.mrb[7].mxu0  ;;  %v401_v37 = vpop.f32.mrb[7].mxu1 }
 0x12b   :  { %v378_v38 = vadd.f32 %v377_v36, %v376_v34  ;;  %v402_v39 = vadd.f32 %v401_v37, %v400_v35 }
 0x12d   :  { %v379_v40 = vpop.f32.mrb[8].mxu0  ;;  %v403_v41 = vpop.f32.mrb[8].mxu1  ;;  %304 = vst [vmem:[#allocation7 + $0x18] sm:$0xff] %v378_v38  ;;  %312 = vst [vmem:[#allocation7 + $0x58] sm:$0xff] %v402_v39 }
 0x12e   :  { %v380_v42 = vpop.f32.mrb[9].mxu0  ;;  %v404_v43 = vpop.f32.mrb[9].mxu1 }
 0x12f   :  { %v381_v44 = vadd.f32 %v380_v42, %v379_v40  ;;  %v405_v45 = vadd.f32 %v404_v43, %v403_v41 }
 0x131   :  { %v382_v46 = vpop.f32.mrb[10].mxu0  ;;  %v406_v47 = vpop.f32.mrb[10].mxu1  ;;  %305 = vst [vmem:[#allocation7 + $0x20] sm:$0xff] %v381_v44  ;;  %313 = vst [vmem:[#allocation7 + $0x60] sm:$0xff] %v405_v45 }
 0x132   :  { %v383_v48 = vpop.f32.mrb[11].mxu0  ;;  %v407_v49 = vpop.f32.mrb[11].mxu1 }
 0x133   :  { %v384_v50 = vadd.f32 %v383_v48, %v382_v46  ;;  %v408_v51 = vadd.f32 %v407_v49, %v406_v47 }
 0x135   :  { %v385_v52 = vpop.f32.mrb[12].mxu0  ;;  %v409_v53 = vpop.f32.mrb[12].mxu1  ;;  %306 = vst [vmem:[#allocation7 + $0x28] sm:$0xff] %v384_v50  ;;  %314 = vst [vmem:[#allocation7 + $0x68] sm:$0xff] %v408_v51 }
 0x136   :  { %v386_v54 = vpop.f32.mrb[13].mxu0  ;;  %v410_v55 = vpop.f32.mrb[13].mxu1 }
 0x137   :  { %v387_v56 = vadd.f32 %v386_v54, %v385_v52  ;;  %v411_v57 = vadd.f32 %v410_v55, %v409_v53 }
 0x139   :  { %v388_v58 = vpop.f32.mrb[14].mxu0  ;;  %v412_v59 = vpop.f32.mrb[14].mxu1  ;;  %307 = vst [vmem:[#allocation7 + $0x30] sm:$0xff] %v387_v56  ;;  %315 = vst [vmem:[#allocation7 + $0x70] sm:$0xff] %v411_v57 }
 0x13a   :  { %v389_v60 = vpop.f32.mrb[15].mxu0  ;;  %v413_v61 = vpop.f32.mrb[15].mxu1 }
 0x13b   :  { %v390_v62 = vadd.f32 %v389_v60, %v388_v58  ;;  %v414_v63 = vadd.f32 %v413_v61, %v412_v59 }
 0x13d   :  { %308 = vst [vmem:[#allocation7 + $0x38] sm:$0xff] %v390_v62  ;;  %316 = vst [vmem:[#allocation7 + $0x78] sm:$0xff] %v414_v63 }
 0x13e   :  { %526 = shalt.err (!%p523_p6)
}
 0x13f   :  { %s527_s12 = scalar_lea.hbm %s609_s2, 2048 }
 0x140   :  { %p528_p7 = scmp.ne.s32.totalorder %s609_s2, %s527_s12  ;;  %p531_p8 = scmp.lt.u32.totalorder %s527_s12, %s609_s2 }
 0x142   :  { %p533_p9 = pnand %p531_p8, %p528_p7 }
 0x144   :  { %536 = shalt.err (!%p533_p9)
}
 0x145   :  { %328 = dma.vmem_to_hbm [thread:$0]  %s323_s8, 2048, %s609_s2, [#allocation4], %s547_s0, %s547_s0, %s548_s5  }
 0x146   :  { %541 = dma.done.wait [#allocation4], 2048  }
 0x147   :  { %542 = vsyncadd [#allocation4], 4294965248 }
 0x148   :  { %332 = vsyncpa [#allocation3], 1 }
 0x149   :  { %333 = vsyncpa [#allocation6], 1 }
 0x14a   :  { %334 = vsyncpa [#allocation4], 1 }

</bundles_post_ra>
